<compile_context>
chip_gen: v7x
topology: tpu7x:2x2x1
jax: 0.10.0
libtpu: 0.0.40
codegen_flags: <defaults>
</compile_context>

<pallas_src>
import jax
import jax.numpy as jnp
from jax.experimental import pallas as pl
from jax.experimental.pallas import tpu as pltpu


# ----------------------------- kernel body ---------------------------------

def _attend(h_ref, a_ref, b_ref, o_ref, mask2):
    # h_ref: (Bblk, S, dim_p)  a_ref: (dim_p, da)  b_ref: (1, da) f32
    # mask2: None or (Bblk, S) f32 (1.0 = padding)   o_ref: (Bblk, dim_p)
    bblk, s, dim = h_ref.shape
    h = h_ref[...]                       # native dtype, fed straight to the MXU
    a = a_ref[...]
    b_row = b_ref[...]                   # (1, da) f32

    # One big MXU matmul for the whole batch block: (Bblk*S, dim) x (dim, da).
    hf = h.reshape(bblk * s, dim)
    t = jnp.tanh(jnp.dot(hf, a, preferred_element_type=jnp.float32))   # (Bblk*S, da)

    # logits as a lane-dense (Bblk, S) tile (S on lanes).
    e = jnp.sum(t.reshape(bblk, s, -1) * b_row, axis=-1)               # (Bblk, S) f32

    if mask2 is not None:
        # batch_has_token: sequence has >= 1 non-padded position (matches PyTorch).
        has_token = jnp.sum(1.0 - mask2, axis=-1, keepdims=True) > 0.0  # (Bblk, 1)
        e = jnp.where(jnp.logical_and(mask2 > 0.0, has_token),
                      jnp.float32(-1e30), e)

    # softmax over the sequence axis (lane reductions, all f32).
    m = jnp.max(e, axis=-1, keepdims=True)                              # (Bblk, 1)
    p = jnp.exp(e - m)                                                  # (Bblk, S)
    l = jnp.sum(p, axis=-1, keepdims=True)                              # (Bblk, 1)
    inv_l = pl.reciprocal(l, approx=True)                               # EUP slot

    # pooled = att^T @ h on the MXU (f32 accumulation), normalization folded after.
    p_cast = p.astype(h.dtype)[:, None, :]                              # (Bblk, 1, S)
    pooled = jnp.einsum('bqs,bsd->bqd', p_cast, h,
                        preferred_element_type=jnp.float32)[:, 0, :]    # (Bblk, dim)
    o_ref[...] = (pooled * inv_l).astype(o_ref.dtype)

    # TODO(synk): return_logits=True (also returning the attention weights) is not
    # implemented; this is the default forward path. `dropout`/`alpha` are unused in
    # the PyTorch forward, so nothing is omitted there.


def _kernel_nomask(h_ref, a_ref, b_ref, o_ref):
    _attend(h_ref, a_ref, b_ref, o_ref, mask2=None)


def _kernel_masked(h_ref, a_ref, b_ref, mask_ref, o_ref):
    mask2 = mask_ref[...][:, 0, :]       # (Bblk, 1, S) -> (Bblk, S)
    _attend(h_ref, a_ref, b_ref, o_ref, mask2=mask2)


# ------------------------------- wrapper ------------------------------------

def self_attention_seq(h, a, b, mask=None, *, vmem_block_budget_bytes=8 * 1024 * 1024):
    """h: [B, S, dim], a: [dim, da], b: [da, 1] or [da],
    mask: optional [B, S] bool (True = padding). Returns [B, dim]."""
    B, S, dim = h.shape
    da = a.shape[-1]
    out_dtype = h.dtype

    # Match MXU operand dtypes (no silent f32 promotion of h); b stays tiny f32.
    a = a.astype(h.dtype)
    b_row = b.reshape(1, da).astype(jnp.float32)

    # Lane-dense h / output: pad dim to a multiple of 128. Padded columns of h and
    # padded rows of a are zero, so tanh(h@a), softmax and att^T@h are unchanged.
    dim_p = ((dim + 127) // 128) * 128
    if dim_p != dim:
        h = jnp.pad(h, ((0, 0), (0, 0), (0, dim_p - dim)))
        a = jnp.pad(a, ((0, dim_p - dim), (0, 0)))

    # Batch blocking: biggest Bblk whose double-buffered h block fits the budget,
    # but keep >= 2 grid steps so both v7x TensorCores get work.
    per_seq_bytes = S * dim_p * h.dtype.itemsize
    bblk = max(1, vmem_block_budget_bytes // (2 * per_seq_bytes))
    if B >= 2:
        bblk = min(bblk, (B + 1) // 2)
    bblk = max(1, min(bblk, B))
    n_blocks = -(-B // bblk)
    B_pad = n_blocks * bblk
    if B_pad != B:
        h = jnp.pad(h, ((0, B_pad - B), (0, 0), (0, 0)))

    in_specs = [
        pl.BlockSpec((bblk, S, dim_p), lambda i: (i, 0, 0)),   # one batch block / step
        pl.BlockSpec((dim_p, da), lambda i: (0, 0)),           # a: VMEM-resident weight
        pl.BlockSpec((1, da), lambda i: (0, 0)),               # b: VMEM-resident row
    ]
    operands = [h, a, b_row]

    if mask is None:
        kernel = _kernel_nomask                                # no mask DMA at all
    else:
        # general boolean mask preserved, stored lane-dense as (B, 1, S) f32.
        mask_f = mask.astype(jnp.float32).reshape(B, 1, S)
        if B_pad != B:
            mask_f = jnp.pad(mask_f, ((0, B_pad - B), (0, 0), (0, 0)))
        in_specs.append(pl.BlockSpec((bblk, 1, S), lambda i: (i, 0, 0)))
        operands.append(mask_f)
        kernel = _kernel_masked

    out = pl.pallas_call(
        kernel,
        out_shape=jax.ShapeDtypeStruct((n_blocks, bblk, dim_p), out_dtype),
        grid_spec=pltpu.PrefetchScalarGridSpec(
            num_scalar_prefetch=0,
            grid=(n_blocks,),
            in_specs=in_specs,
            # 3D output so the block's last two dims equal the full array dims
            # (valid for any Bblk) while stores stay lane-dense (dim_p % 128 == 0).
            out_specs=pl.BlockSpec((None, bblk, dim_p), lambda i: (i, 0, 0)),
        ),
        compiler_params=pltpu.CompilerParams(
            dimension_semantics=("parallel",),       # batch blocks independent
            vmem_limit_bytes=32 * 1024 * 1024,
        ),
    )(*operands)

    return out.reshape(B_pad, dim_p)[:B, :dim]


# ------------------------------ reference -----------------------------------

def _reference(h, a, b, mask=None):
    e = jnp.matmul(jnp.tanh(jnp.matmul(h, a)), b)                     # (B, S, 1)
    if mask is not None:
        full_mask = -1e30 * mask.astype(jnp.float32)                  # (B, S)
        batch_mask = (jnp.sum(jnp.logical_not(mask), axis=-1) > 0
                      ).astype(jnp.float32)[:, None]                  # (B, 1)
        e = e + (full_mask * batch_mask)[..., None]
    attention = jax.nn.softmax(e, axis=1)                             # (B, S, 1)
    return jnp.matmul(jnp.swapaxes(attention, 1, 2), h)[:, 0, :]      # (B, dim)


if __name__ == "__main__":
    B, S, dim, da = 4, 16, 64, 32

    key = jax.random.PRNGKey(0)
    kh, ka, kb = jax.random.split(key, 3)

    h = jax.random.normal(kh, (B, S, dim), dtype=jnp.float32)
    # synthetic params (PyTorch uses xavier_uniform; exact values irrelevant here)
    a = jax.random.normal(ka, (dim, da), dtype=jnp.float32) * (1.0 / dim ** 0.5)
    b = jax.random.normal(kb, (da, 1), dtype=jnp.float32) * (1.0 / da ** 0.5)

    # padding mask: True = padding token; last row is fully padded (has_token == 0).
    lengths = jnp.array([S, 9, 4, 0], dtype=jnp.int32)
    mask = jnp.arange(S, dtype=jnp.int32)[None, :] >= lengths[:, None]  # (B, S) bool

    tol = dict(atol=2e-3, rtol=2e-3)   # approx EUP reciprocal in the kernel

    # default path (mask=None, return_logits=False)
    out = jax.block_until_ready(self_attention_seq(h, a, b))
    ref = _reference(h, a, b)
    assert out.shape == (B, dim)
    assert jnp.allclose(out, ref, **tol), "mismatch vs reference (mask=None)"

    # masked path (includes an all-padded sequence)
    out_m = jax.block_until_ready(self_attention_seq(h, a, b, mask=mask))
    ref_m = _reference(h, a, b, mask=mask)
    assert out_m.shape == (B, dim)
    assert jnp.allclose(out_m, ref_m, **tol), "mismatch vs reference (masked)"

    print("KERNEL_OK")
</pallas_src>

<mosaic_0001>
module attributes {stable_mosaic.version = 11 : i64} {
  func.func @_kernel_nomask(%arg0: i32, %arg1: memref<2x16x128xf32, #tpu.memory_space<vmem>>, %arg2: memref<128x32xf32, #tpu.memory_space<vmem>>, %arg3: memref<1x32xf32, #tpu.memory_space<vmem>>, %arg4: memref<1x2x128xf32, #tpu.memory_space<vmem>>) attributes {dimension_semantics = [#tpu.dimension_semantics<parallel>], iteration_bounds = array<i64: 2>, scalar_prefetch = 0 : i64, scratch_operands = 0 : i64, tpu.core_type = #tpu.core_type<tc>, window_params = [{transform_indices = @transform_0, window_bounds = array<i64: 2, 16, 128>}, {pipeline_mode = #tpu.pipeline_mode<synchronous>, transform_indices = @transform_1, window_bounds = array<i64: 128, 32>}, {pipeline_mode = #tpu.pipeline_mode<synchronous>, transform_indices = @transform_2, window_bounds = array<i64: 1, 32>}, {transform_indices = @transform_3, window_bounds = array<i64: 1, 2, 128>}]} {
    %c0 = arith.constant 0 : index
    %c0_0 = arith.constant 0 : index
    %c0_1 = arith.constant 0 : index
    %0 = vector.load %arg1[%c0, %c0_0, %c0_1] : memref<2x16x128xf32, #tpu.memory_space<vmem>>, vector<2x16x128xf32>
    %c0_2 = arith.constant 0 : index
    %c0_3 = arith.constant 0 : index
    %1 = vector.load %arg2[%c0_2, %c0_3] : memref<128x32xf32, #tpu.memory_space<vmem>>, vector<128x32xf32>
    %c0_4 = arith.constant 0 : index
    %c0_5 = arith.constant 0 : index
    %2 = vector.load %arg3[%c0_4, %c0_5] : memref<1x32xf32, #tpu.memory_space<vmem>>, vector<1x32xf32>
    %3 = vector.shape_cast %0 : vector<2x16x128xf32> to vector<32x128xf32>
    %cst = arith.constant dense<0.000000e+00> : vector<32x32xf32>
    %4 = tpu.matmul %3, %1, %cst {dimension_numbers = #tpu.dot_dimension_numbers<[1], [0], [0], [1], [0, 0, 1, 1], [], []>} : vector<32x128xf32>, vector<128x32xf32>, vector<32x32xf32> -> vector<32x32xf32>
    %5 = math.tanh %4 : vector<32x32xf32>
    %6 = vector.shape_cast %5 : vector<32x32xf32> to vector<2x16x32xf32>
    %7 = vector.shape_cast %2 : vector<1x32xf32> to vector<1x1x32xf32>
    %8 = vector.broadcast %7 : vector<1x1x32xf32> to vector<2x16x32xf32>
    %9 = arith.mulf %6, %8 : vector<2x16x32xf32>
    %cst_6 = arith.constant dense<0.000000e+00> : vector<2x16xf32>
    %10 = vector.multi_reduction <add>, %9, %cst_6 [2] : vector<2x16x32xf32> to vector<2x16xf32>
    %cst_7 = arith.constant dense<0xFF800000> : vector<2xf32>
    %11 = vector.multi_reduction <maximumf>, %10, %cst_7 [1] : vector<2x16xf32> to vector<2xf32>
    %12 = vector.shape_cast %11 : vector<2xf32> to vector<2x1xf32>
    %13 = vector.broadcast %12 : vector<2x1xf32> to vector<2x16xf32>
    %14 = arith.subf %10, %13 : vector<2x16xf32>
    %15 = math.exp %14 : vector<2x16xf32>
    %cst_8 = arith.constant dense<0.000000e+00> : vector<2xf32>
    %16 = vector.multi_reduction <add>, %15, %cst_8 [1] : vector<2x16xf32> to vector<2xf32>
    %17 = vector.shape_cast %16 : vector<2xf32> to vector<2x1xf32>
    %18 = tpu.reciprocal %17 {approx = true} : vector<2x1xf32> -> vector<2x1xf32>
    %19 = vector.shape_cast %15 : vector<2x16xf32> to vector<2x1x16xf32>
    "tpu.trace_start"() <{level = 10 : i32, message = "bqs,bsd->bqd"}> : () -> ()
    %cst_9 = arith.constant dense<0.000000e+00> : vector<2x1x128xf32>
    %20 = tpu.matmul %19, %0, %cst_9 {dimension_numbers = #tpu.dot_dimension_numbers<[2], [1], [1], [2], [0, 0, 0, 1, 1, 2], [0], [0]>} : vector<2x1x16xf32>, vector<2x16x128xf32>, vector<2x1x128xf32> -> vector<2x1x128xf32>
    "tpu.trace_stop"() : () -> ()
    %21 = vector.shape_cast %20 : vector<2x1x128xf32> to vector<2x128xf32>
    %22 = vector.broadcast %18 : vector<2x1xf32> to vector<2x128xf32>
    %23 = arith.mulf %21, %22 : vector<2x128xf32>
    %c0_10 = arith.constant 0 : index
    %c0_11 = arith.constant 0 : index
    %c0_12 = arith.constant 0 : index
    %24 = vector.load %arg4[%c0_10, %c0_11, %c0_12] : memref<1x2x128xf32, #tpu.memory_space<vmem>>, vector<1x2x128xf32>
    %25 = vector.shape_cast %24 : vector<1x2x128xf32> to vector<2x128xf32>
    %26 = vector.shape_cast %23 : vector<2x128xf32> to vector<1x2x128xf32>
    tpu.vector_store %arg4[%c0_10, %c0_11, %c0_12], %26 {strides = array<i32>} : memref<1x2x128xf32, #tpu.memory_space<vmem>>, vector<1x2x128xf32>,
    return
  }
  func.func @transform_0(%arg0: i32) -> (i32, i32, i32) {
    %c0_i32 = arith.constant 0 : i32
    %c0_i32_0 = arith.constant 0 : i32
    %c0_i32_1 = arith.constant 0 : i32
    return %arg0, %c0_i32, %c0_i32_0 : i32, i32, i32
  }
  func.func @transform_1(%arg0: i32) -> (i32, i32) {
    %c0_i32 = arith.constant 0 : i32
    %c0_i32_0 = arith.constant 0 : i32
    %c0_i32_1 = arith.constant 0 : i32
    return %c0_i32, %c0_i32_0 : i32, i32
  }
  func.func @transform_2(%arg0: i32) -> (i32, i32) {
    %c0_i32 = arith.constant 0 : i32
    %c0_i32_0 = arith.constant 0 : i32
    %c0_i32_1 = arith.constant 0 : i32
    return %c0_i32, %c0_i32_0 : i32, i32
  }
  func.func @transform_3(%arg0: i32) -> (i32, i32, i32) {
    %c0_i32 = arith.constant 0 : i32
    %c0_i32_0 = arith.constant 0 : i32
    %c0_i32_1 = arith.constant 0 : i32
    return %arg0, %c0_i32, %c0_i32_0 : i32, i32, i32
  }
}

</mosaic_0001>

<bundles_post_ra>
// kernel: tpu_custom_call.1
= control target key start
LH: loop header
LB: loop body
LE: loop exit
PB: predicated region body
PF: predicated region fallthrough
CT: control target
= control target key end

     0   :  { %8 = vsyncpa [#allocation3], 0  ;;  %s1115_s0 = inlined_call_operand.vmem [shape: f32[4,16,128], index: 0, kind: input, shape index: {}]   ;;  %s1116_s1 = inlined_call_operand.vmem [shape: f32[128,32], index: 1, kind: input, shape index: {}]   ;;  %s1117_s2 = inlined_call_operand.vmem [shape: f32[1,32], index: 2, kind: input, shape index: {}]   ;;  %s1118_s3 = inlined_call_operand.hbm [shape: f32[2,2,128], index: 3, kind: output, shape index: {}]  }
   0x1   :  { %10 = vsyncpa [#allocation3 + $0x1], 0  ;;  %s917_s12 = smov 0   ;;  %s919_s13 = smov 0  }
   0x2   :  { %s921_s14 = smov 0   ;;  %s923_s15 = smov 0  }
   0x3 LB: > { %s938_s16 = sadd.s32 4294967295, %s890_s15   ;;  %s633_s17 = sadd.s32 4294967294, %s890_s15   ;;  %s890_s15 = sphi %s923_s15, %s1124_s15   ;;  %s886_s14 = sphi %s921_s14, %s1123_s14   ;;  %s882_s13 = sphi %s919_s13, %s1122_s13   ;;  %s878_s12 = sphi %s917_s12, %s1121_s12  }
   0x4   : > { %s942_s18 = sadd.s32 1, %s890_s15   ;;  %s91_s19 = sadd.s32 1, %s886_s14 }
   0x5   : > { %s88_s20 = ssub.s32 %s890_s15, %s942_s18  ;;  %p101_p0 = scmp.ne.s32.totalorder %s886_s14, %s882_s13 }
   0x6   : > { %p89_p1 = scmp.eq.s32.totalorder %s88_s20, 0  ;;  %p102_p2 = scmp.eq.s32.totalorder %s938_s16, 1 }
   0x7   : > { %p107_p3 = scmp.ne.s32.totalorder %s882_s13, %s878_s12  ;;  %p108_p4 = scmp.eq.s32.totalorder %s633_s17, 1 }
   0x8   : > { %s953_s21 = scalar_select %p89_p1, %s886_s14, %s91_s19  }
   0x9   : > { %p955_p5 = por %p102_p2, %p101_p0  ;;  %p959_p6 = por %p108_p4, %p107_p3 }
   0xa   : > { %p636_p7 = scmp.ge.s32.totalorder %s890_s15, 1  ;;  %p142_p8 = scmp.lt.s32.totalorder %s890_s15, 3 }
   0xc   : > { %p143_p9 = pnand %p636_p7, %p142_p8 }
   0xd   : > { %v178_v0 = vld [vmem:[%s1116_s1] sm:$0xff] (!%p143_p9)  ;;  %v179_v1 = vld [vmem:[%s1116_s1 + $0x8] sm:$0xff] (!%p143_p9)  ;;  %v180_v2 = vld [vmem:[%s1116_s1 + $0x10] sm:$0xff] (!%p143_p9)  ;;  %s638_s30 = sshll.u32 (!%p143_p9), %s938_s16, 1  ;;  %vm294_vm0 = vcmask (!%p143_p9), 261120   ;;  %v311_v46 = vlaneseq (!%p143_p9)  ;;  %vm322_vm1 = vcmask (!%p143_p9), 130112  }
   0xe   : > { %146 = sbr.rel (%p143_p9) target bundleno = 959 (0x3bf), region = 32  ;;  %v727_v3 = vpack.c.bf16 (!%p143_p9), %v179_v1, %v178_v0  ;;  %v181_v4 = vld [vmem:[%s1116_s1 + $0x18] sm:$0xff] (!%p143_p9)  ;;  %p168_p10 = scmp.lt.s32.totalorder (!%p143_p9), %s638_s30, 3  ;;  %v182_v6 = vld [vmem:[%s1116_s1 + $0x20] sm:$0xff] (!%p143_p9)  ;;  %v183_v7 = vld [vmem:[%s1116_s1 + $0x28] sm:$0xff] (!%p143_p9)  ;;  %vm333_vm2 = vcmask (!%p143_p9), 1041409  }
   0xf   : > { %v731_v5 = vpack.c.bf16 (!%p143_p9), %v181_v4, %v180_v2  ;;  %v735_v8 = vpack.c.bf16 (!%p143_p9), %v183_v7, %v182_v6  ;;  %v184_v9 = vld [vmem:[%s1116_s1 + $0x30] sm:$0xff] (!%p143_p9)  ;;  %v185_v10 = vld [vmem:[%s1116_s1 + $0x38] sm:$0xff] (!%p143_p9)  ;;  %v186_v16 = vld [vmem:[%s1116_s1 + $0x40] sm:$0xff] (!%p143_p9)  ;;  %v312_v47 = vand.u32 (!%p143_p9), 127, %v311_v46  ;;  %v314_v50 = vshrl.u32 (!%p143_p9), %v311_v46, 7  ;;  %s645_s29 = sshll.u32 (!%p143_p9), %s938_s16, 5 }
  0x10   : > { %728 = vmatprep.subr.bf16.mxu0 (!%p143_p9), %v727_v3  ;;  %v739_v14 = vpack.c.bf16 (!%p143_p9), %v185_v10, %v184_v9  ;;  %v187_v17 = vld [vmem:[%s1116_s1 + $0x48] sm:$0xff] (!%p143_p9)  ;;  %v188_v19 = vld [vmem:[%s1116_s1 + $0x50] sm:$0xff] (!%p143_p9)  ;;  %v189_v20 = vld [vmem:[%s1116_s1 + $0x58] sm:$0xff] (!%p143_p9)  ;;  %vm336_vm3 = vcmask (!%p143_p9), 123904   ;;  %v892_v0 = vmov (!%p143_p9), 0   ;;  %v893_v1 = vmov (!%p143_p9), 0.0|0.0   ;;  %s1072_s7 = scalar_lea.hbm (!%p143_p9), %s1118_s3, %s645_s29 }
  0x11   : > { %730 = vmatpush3.bf16.msra.mxu0 (!%p143_p9), %v727_v3  ;;  %v743_v18 = vpack.c.bf16 (!%p143_p9), %v187_v17, %v186_v16  ;;  %v747_v21 = vpack.c.bf16 (!%p143_p9), %v189_v20, %v188_v19  ;;  %v190_v22 = vld [vmem:[%s1116_s1 + $0x60] sm:$0xff] (!%p143_p9)  ;;  %v191_v23 = vld [vmem:[%s1116_s1 + $0x68] sm:$0xff] (!%p143_p9)  ;;  %v192_v25 = vld [vmem:[%s1116_s1 + $0x70] sm:$0xff] (!%p143_p9)  ;;  %v317_v48 = vadd.s32 (!%p143_p9), 4294967288, %v312_v47  ;;  %v1042_v54 = vsub.s32 (!%p143_p9), %v312_v47, %v314_v50  ;;  %809 = vset.pattern.permute.xlu0 (!%p143_p9), %v892_v0  ;;  %s896_s16 = smov (!%p143_p9), [#allocation2]  }
  0x12   : > { %732 = vmatprep.subr.bf16.mxu0 (!%p143_p9), %v731_v5  ;;  %v751_v24 = vpack.c.bf16 (!%p143_p9), %v191_v23, %v190_v22  ;;  %v193_v26 = vld [vmem:[%s1116_s1 + $0x78] sm:$0xff] (!%p143_p9)  ;;  %v641_v33 = vld [vmem:[%s1117_s2] ss:$0 sm:$0xff] (!%p143_p9)  ;;  %808 = vset.pattern.permute.xlu1 (!%p143_p9), %v892_v0  ;;  %v343_v2 = vsub.s32 (!%p143_p9), 0, %v314_v50  ;;  %v347_v3 = vsub.s32 (!%p143_p9), 1, %v314_v50  ;;  %vm894_vm4 = vmmov (!%p143_p9), 0  }
  0x13   : > { %v755_v27 = vpack.c.bf16 (!%p143_p9), %v193_v26, %v192_v25  ;;  %v1040_v51 = vsub.s32 (!%p143_p9), %v317_v48, %v314_v50  ;;  %759 = vmatprep.subr.bf16.mxu1 (!%p143_p9), %v893_v1  ;;  %v895_v22 = vmov (!%p143_p9), 0.0   ;;  %vm403_vm5 = vcmask (!%p143_p9), 130048  }
  0x14   : > { %717 = vmatprep.mubr.msk.f32.mxu1 (!%p143_p9), %vm894_vm4, %v895_v22 }
  0x15   : > { %s1126_s30 = smov (!%p168_p10, %s638_s30), 3  ;;  %734 = vmatpush3.bf16.msra.mxu0 %v731_v5 }
  0x16   : > { %s648_s10 = sshll.u32 %s1126_s30, 4  ;;  %736 = vmatprep.subr.bf16.mxu0 %v735_v8 }
  0x17   : > { %s993_s26 = scalar_lea.vmem %s1115_s0, %s648_s10  ;;  %s832_s10 = sshll.u32 %s896_s16, 4  ;;  %s833_s10 = int_to_ptr.vmem [resolvable:$false] %s832_s10 }
  0x18   : > { %v996_v11 = vld [vmem:[%s993_s26] sm:$0xff]  ;;  %v1000_v12 = vld [vmem:[%s993_s26 + $0x10] sm:$0xff]  ;;  %v1003_v13 = vld [vmem:[%s993_s26 + $0x18] sm:$0xff]  ;;  %s834_s11 = scalar_lea.vmem %s833_s10, 64 }
  0x19   : > { %707 = vmatprep.mubr.f32.mxu0 %v996_v11  ;;  %v763_v15 = vpack.c.bf16 %v1003_v13, %v1000_v12  ;;  %738 = vmatpush3.bf16.msra.mxu0 %v735_v8  ;;  %v1032_v28 = vld [vmem:[%s993_s26 + $0x8] sm:$0xff]  ;;  %s164_s26 = sand.u32 1, %s882_s13  }
  0x1a   : > { %740 = vmatprep.subr.bf16.mxu0 %v739_v14  ;;  %s637_s28 = sshll.u32 %s164_s26, 1  ;;  %s561_s8 = scalar_lea.sflag [#allocation3], %s164_s26 }
  0x1b   : > { %s166_s30 = scalar_lea.vmem [#allocation2], %s637_s28 }
  0x1c   : > { %s574_s4 = sshll.u32 %s166_s30, 4  ;;  %s1074_s4 = int_to_ptr.vmem [resolvable:$true] %s574_s4 }
  0x1d   : > { %742 = vmatpush3.bf16.msra.mxu0 %v739_v14  ;;  %s828_s9 = scalar_lea.vmem %s1074_s4, 32  ;;  %p835_p0 = scmp.lt.s32.totalorder %s1074_s4, %s833_s10 }
  0x1e   : > { %744 = vmatprep.subr.bf16.mxu0 %v743_v18  ;;  %p829_p11 = scmp.ne.s32.totalorder %s1074_s4, %s828_s9  ;;  %p836_p1 = scmp.lt.s32.totalorder %s834_s11, %s828_s9 }
  0x20   : > { %p830_p12 = pnand %p829_p11, %p955_p5  ;;  %p837_p2 = por %p836_p1, %p835_p0 }
  0x21   : > { %746 = vmatpush3.bf16.msra.mxu0 %v743_v18 }
  0x22   : > { %748 = vmatprep.subr.bf16.mxu0 %v747_v21  ;;  %p831_p13 = pneg %p830_p12 }
  0x24   : > { %p838_p3 = pnand %p837_p2, %p831_p13 }
  0x25   : > { %750 = vmatpush3.bf16.msra.mxu0 %v747_v21  ;;  %v760_v21 = vpack.c.bf16 %v1032_v28, %v996_v11 }
  0x26   : > { %752 = vmatprep.subr.bf16.mxu0 %v751_v24 }
  0x27   : > { %761 = vmatpush3.bf16.msra.mxu1 %v760_v21 }
  0x28   : > { %762 = vmatprep.subr.bf16.mxu1 %v893_v1 }
  0x29   : > { %754 = vmatpush3.bf16.msra.mxu0 %v751_v24 }
  0x2a   : > { %756 = vmatprep.subr.bf16.mxu0 %v755_v27 }
  0x2d   : > { %758 = vmatpush3.bf16.msra.mxu0 %v755_v27 }
  0x30   : > { %708 = vmatmul.mubr.f32.vlgmr.msra.gmra.mrb[0].mxu0 %v1032_v28 }
  0x31   : > { %710 = vmatprep.mubr.f32.mxu0 %v1000_v12 }
  0x34   : > { %711 = vmatmul.mubr.f32.gmra.mrb[2].mxu0 %v1003_v13 }
 0x103   : > { %v709_v29 = vpop.f32.mrb[0].mxu0 }
 0x104   : > { %810 = vtanh.f32 %v709_v29  ;;  %v261_v30 = vpop.f32.mrb[1].mxu0 }
 0x105   : > { %812 = vtanh.f32 %v261_v30 }
 0x107   : > { %v712_v31 = vpop.f32.mrb[2].mxu0 }
 0x108   : > { %814 = vtanh.f32 %v712_v31  ;;  %v271_v32 = vpop.f32.mrb[3].mxu0 }
 0x109   : > { %816 = vtanh.f32 %v271_v32 }
 0x10e   : > { %v811_v34 = vpop.eup %810 }
 0x10f   : > { %v813_v35 = vpop.eup %812  ;;  %v291_v39 = vmul.f32 %v811_v34, %v641_v33 }
 0x110   : > { %v290_v36 = vmul.f32 %v813_v35, %v641_v33 }
 0x111   : > { %v298_v42 = vsel %vm294_vm0, %v291_v39, 0.0 }
 0x112   : > { %v815_v37 = vpop.eup %814  ;;  %v295_v38 = vsel %vm294_vm0, %v290_v36, 0.0 }
 0x113   : > { %v817_v40 = vpop.eup %816  ;;  %296 = vadd.xlane.f32.xlu0 %v295_v38  ;;  %v293_v44 = vmul.f32 %v815_v37, %v641_v33 }
 0x114   : > { %v292_v41 = vmul.f32 %v817_v40, %v641_v33 }
 0x115   : > { %v304_v45 = vsel %vm294_vm0, %v293_v44, 0.0 }
 0x116   : > { %v301_v43 = vsel %vm294_vm0, %v292_v41, 0.0 }
 0x117   : > { %299 = vadd.xlane.f32.xlu0 %v298_v42  ;;  %302 = vadd.xlane.f32.xlu1 %v301_v43 }
 0x11b   : > { %305 = vadd.xlane.f32.xlu1 %v304_v45 }
 0x1a0   : > { %v297_v49 = vpop.xlane.xlu0 %296 }
 0x1a1   : > { %v316_v57 = vrot.slane %v297_v49, %v1042_v54 }
 0x1a4   : > { %v300_v52 = vpop.xlane.xlu0 %299  ;;  %v303_v53 = vpop.xlane.xlu1 %302 }
 0x1a5   : > { %v321_v55 = vrot.slane %v300_v52, %v1040_v51  ;;  %v327_v58 = vrot.slane %v303_v53, %v1042_v54 }
 0x1a7   : > { %v323_v60 = vsel %vm322_vm1, %v321_v55, %v316_v57 }
 0x1a8   : > { %v306_v56 = vpop.xlane.xlu1 %305 }
 0x1a9   : > { %v331_v59 = vrot.slane %v306_v56, %v1040_v51 }
 0x1ab   : > { %v332_v61 = vsel %vm322_vm1, %v331_v59, %v327_v58 }
 0x1ac   : > { %v334_v62 = vsel %vm333_vm2, %v332_v61, %v323_v60 }
 0x1ad   : > { %v337_v63 = vsel %vm336_vm3, %v334_v62, -inf }
 0x1ae   : > { %338 = vmax.xlane.f32.xlu0 %v337_v63 }
 0x23b   : > { %v339_v4 = vpop.xlane.xlu0 %338 }
 0x23c   : > { %v344_v5 = vrot.slane %v339_v4, %v343_v2  ;;  %v348_v6 = vrot.slane %v339_v4, %v347_v3 }
 0x23e   : > { %v351_v7 = vsub.f32 %v297_v49, %v344_v5  ;;  %v352_v8 = vsub.f32 %v300_v52, %v344_v5  ;;  %v353_v9 = vsub.f32 %v303_v53, %v348_v6  ;;  %v354_v16 = vsub.f32 %v306_v56, %v348_v6 }
 0x240   : > { %v355_v10 = vmul.f32 1.442695, %v351_v7  ;;  %v357_v14 = vmul.f32 1.442695, %v352_v8  ;;  %v359_v17 = vmul.f32 1.442695, %v353_v9 }
 0x241   : > { %v361_v18 = vmul.f32 1.442695, %v354_v16 }
 0x242   : > { %818 = vpow2.f32 %v355_v10 }
 0x243   : > { %820 = vpow2.f32 %v357_v14 }
 0x244   : > { %822 = vpow2.f32 %v359_v17 }
 0x245   : > { %824 = vpow2.f32 %v361_v18 }
 0x24c   : > { %v819_v19 = vpop.eup %818 }
 0x24d   : > { %v821_v20 = vpop.eup %820  ;;  %368 = vperm.xlu1 %808, %v819_v19  }
 0x24e   : > { %371 = vperm.xlu0 %809, %v821_v20   ;;  %v823_v23 = vpop.eup %822 }
 0x24f   : > { %v825_v24 = vpop.eup %824 }
 0x251   : > { %374 = vperm.xlu1 %808, %v823_v23  }
 0x255   : > { %377 = vperm.xlu1 %808, %v825_v24  }
 0x2cc   : > { %v369_v25 = vpop.permute.xlu1 %368 }
 0x2cd   : > { %v372_v26 = vpop.permute.xlu0 %371  ;;  %v382_v27 = vrot.slane %v369_v25, %v1042_v54 }
 0x2ce   : > { %v386_v29 = vrot.slane %v372_v26, %v1040_v51 }
 0x2d0   : > { %v387_v11 = vsel %vm322_vm1, %v386_v29, %v382_v27  ;;  %v375_v28 = vpop.permute.xlu1 %374 }
 0x2d1   : > { %718 = vmatmul.mubr.msk.f32.vlgmr.msra.gmra.mrb[0].mxu1 %vm403_vm5, %v387_v11  ;;  %v391_v31 = vrot.slane %v375_v28, %v1042_v54 }
 0x2d2   : > { %764 = vmatpush3.bf16.msra.mxu1 %v763_v15  ;;  %724 = vmatprep.mubr.msk.f32.mxu1 %vm894_vm4, %v895_v22 }
 0x2d4   : > { %v378_v30 = vpop.permute.xlu1 %377 }
 0x2d5   : > { %v395_v32 = vrot.slane %v378_v30, %v1040_v51 }
 0x2d7   : > { %v396_v33 = vsel %vm322_vm1, %v395_v32, %v391_v31 }
 0x2d8   : > { %725 = vmatmul.mubr.msk.f32.vlgmr.msra.gmra.mrb[2].mxu1 %vm403_vm5, %v396_v33  ;;  %v397_v34 = vsel %vm333_vm2, %v396_v33, %v387_v11 }
 0x2d9   : > { %v399_v35 = vsel %vm336_vm3, %v397_v34, 0.0 }
 0x2da   : > { %400 = vadd.xlane.f32.xlu1 %v399_v35 }
 0x367   : > { %v401_v36 = vpop.xlane.xlu1 %400 }
 0x368   : > { %826 = vrcp.f32 %v401_v36 }
 0x372   : > { %v827_v15 = vpop.eup %826 }
 0x373   : > { %v549_v37 = vrot.slane %v827_v15, 1 }
 0x3a4   : > { %v472_v12 = vpop.f32.mrb[0].mxu1 }
 0x3a5   : > { %v719_v13 = vpop.f32.mrb[1].mxu1  ;;  %v552_v41 = vmul.f32 %v827_v15, %v472_v12 }
 0x3ab   : > { %v544_v38 = vpop.f32.mrb[2].mxu1 }
 0x3ac   : > { %v553_v39 = vmul.f32 %v549_v37, %v544_v38  ;;  %v726_v40 = vpop.f32.mrb[3].mxu1 }
 0x3ae   : > { %v556_v42 = vrot.slane %v553_v39, 7 }
 0x3b0   : > { %v557_v43 = vsel %vm333_vm2, %v556_v42, %v552_v41 }
 0x3b1   : > { %559 = vst [vmem:[%s166_s30] sm:$0x3] %v557_v43 }
 0x3b2   : > { %841 = shalt.err (!%p838_p3)
}
 0x3b3   : > { %s842_s17 = scalar_lea.hbm %s1072_s7, 32  ;;  %s846_s24 = scalar_lea.hbm %s1118_s3, 64 }
 0x3b4   : > { %p843_p4 = scmp.ne.s32.totalorder %s1072_s7, %s842_s17  ;;  %p847_p9 = scmp.lt.u32.totalorder %s1072_s7, %s1118_s3 }
 0x3b5   : > { %p848_p10 = scmp.lt.u32.totalorder %s846_s24, %s842_s17  ;;  %p850_p12 = scmp.lt.u32.totalorder %s842_s17, %s1072_s7 }
 0x3b6   : > { %p844_p7 = pnand %p843_p4, %p955_p5 }
 0x3b7   : > { %p849_p11 = por %p848_p10, %p847_p9 }
 0x3b8   : > { %p845_p8 = pneg %p844_p7 }
 0x3b9   : > { %p851_p13 = por %p850_p12, %p849_p11 }
 0x3bb   : > { %p852_p0 = pnand %p851_p13, %p845_p8 }
 0x3bd   : > { %855 = shalt.err (!%p852_p0)
}
 0x3be   : > { %765 = dma.vmem_to_hbm [thread:$0]  (%p955_p5), %s1074_s4, 32, %s1072_s7, %s561_s8  }
 0x3bf PF: > { %p771_p1 = scmp.ge.s32.totalorder %s890_s15, 2  ;;  %s586_s26 = sand.u32 1, %s878_s12  }
 0x3c0   : > { %s587_s28 = scalar_lea.sflag [#allocation3], %s586_s26 }
 0x3c1   : > { %p768_p2 = pnand %p771_p1, %p959_p6 }
 0x3c3   : > { %873 = dma.done.wait (!%p768_p2), %s587_s28, 32  }
 0x3c4   : > { %875 = vsyncadd (!%p768_p2), %s587_s28, 4294967264  ;;  %p13_p3 = scmp.ge.s32.totalorder %s942_s18, 4   ;;  %s1121_s12 = smov %s882_s13 }
 0x3c5   : > { %s1122_s13 = smov %s886_s14  ;;  %s1123_s14 = smov %s953_s21 }
 0x3c6   : > { %s1124_s15 = smov %s942_s18  ;;  %15 = sbr.rel (!%p13_p3) target bundleno = 3 (0x3), region = 67 }
 0x3cd   :  { %592 = vsyncpa [#allocation3], 1 }
 0x3ce   :  { %594 = vsyncpa [#allocation3 + $0x1], 1 }

</bundles_post_ra>
